<compile_context>
chip_gen: v5e
topology: v5e:2x2
jax: 0.10.0
libtpu: 0.0.40
codegen_flags: <defaults>
</compile_context>

<pallas_src>
import functools

import numpy as np
import jax
import jax.numpy as jnp
from jax.experimental import pallas as pl
from jax.experimental.pallas import tpu as pltpu


_TWO_PI = np.float32(2.0 * np.pi)


# ---------------------------------------------------------------------------
# Pallas kernel: one frequency tile per grid step (single signal).
# ---------------------------------------------------------------------------
def _snr_tile_kernel(x_ref, w_ref, wm_ref, um_ref, out_ref, *, tn):
    # x_ref  : [Npad, 1]   f32 signal as a column (time index -> sublanes)
    # w_ref  : [1, TF]     f32 normalized frequency omega = f / fs (cycles/sample)
    # wm_ref : [1, TF]     wanted mask, pre-scaled by 1/n_wanted
    # um_ref : [1, TF]     unwanted mask, pre-scaled by 1/n_unwanted
    # out_ref: [1, 8, 128] partial sums (sublane 0 = wanted, sublane 1 = unwanted)
    npad = x_ref.shape[0]
    tf = w_ref.shape[1]
    blocks_per_chunk = tn // 8            # rotations between exact re-seeds
    n_chunks = npad // tn

    w = w_ref[...]                        # [1, TF]

    # Exact EUP trig only for (a) the per-8-row rotation step and (b) one 8-row
    # seed block per TN-row chunk.  Everything else is VPU angle addition.
    d8 = 8.0 * w
    d8 = d8 - jnp.floor(d8)               # frac(8*omega)
    cos_d = jnp.cos(_TWO_PI * d8)          # [1, TF]
    sin_d = jnp.sin(_TWO_PI * d8)

    r_idx = jax.lax.broadcasted_iota(jnp.int32, (8, tf), 0).astype(jnp.float32)
    row_off = r_idx * w                    # [8, TF]  r*omega, r < 8 (small, exact-ish)

    dchunk = tn * w
    dchunk = dchunk - jnp.floor(dchunk)    # frac(TN*omega), carried base-phase step

    def chunk_body(c, carry):
        base, pc, ps = carry               # base: [1,TF]; pc/ps: [8,TF] projections
        # Exact seed block for rows c*TN + (0..7)  (EUP).
        ph = base + row_off
        ph = ph - jnp.floor(ph)
        ang = _TWO_PI * ph
        cb = jnp.cos(ang)                  # [8, TF]
        sb = jnp.sin(ang)

        def blk_body(k, inner):
            cbk, sbk, pck, psk = inner
            t0 = pl.multiple_of(c * tn + k * 8, 8)
            xk = x_ref[pl.ds(t0, 8), :]    # [8, 1] signal values for these 8 rows
            pck = pck + xk * cbk           # VPU FMA accumulate of projections
            psk = psk + xk * sbk
            # Rotate to the next 8 rows (angle addition, VPU: 4 mul + 2 add).
            cn = cbk * cos_d - sbk * sin_d
            sn = sbk * cos_d + cbk * sin_d
            return cn, sn, pck, psk

        _, _, pc, ps = jax.lax.fori_loop(0, blocks_per_chunk, blk_body,
                                         (cb, sb, pc, ps))
        # Carried, range-reduced base phase for the next chunk (f32-safe).
        base = base + dchunk
        base = base - jnp.floor(base)
        return base, pc, ps

    init = (jnp.zeros((1, tf), jnp.float32),
            jnp.zeros((8, tf), jnp.float32),
            jnp.zeros((8, tf), jnp.float32))
    _, pc, ps = jax.lax.fori_loop(0, n_chunks, chunk_body, init)

    ct = jnp.sum(pc, axis=0, keepdims=True)      # [1, TF]  (one XLU sublane reduce)
    st = jnp.sum(ps, axis=0, keepdims=True)
    psd = ct * ct + st * st                      # [1, TF]

    # Masked means (masks pre-scaled by 1/count on host); padded lanes are 0.
    wanted = jnp.sum(psd * wm_ref[...])
    unwanted = jnp.sum(psd * um_ref[...])

    row = jax.lax.broadcasted_iota(jnp.int32, out_ref.shape, 1)
    out_ref[...] = jnp.where(row == 0, wanted,
                             jnp.where(row == 1, unwanted, 0.0))


def _vmem_limit_bytes():
    cap = 128 * 1024 * 1024
    try:
        info = pltpu.get_tpu_info()
        cap = int(getattr(info, "vmem_capacity_bytes", cap)) or cap
    except Exception:
        pass
    # <=~40 MiB on 64 MiB/TC parts (v7x), up to 96 MiB on 128 MiB parts (v5e/v6e).
    return int(max(32 * 1024 * 1024, min(cap - 24 * 1024 * 1024, 96 * 1024 * 1024)))


def _pallas_partial_sums(x_col, omega, wmask, umask, tile_f, tn):
    """x_col: [Npad,1] f32; omega/masks: [1, Fp] f32 (Fp % tile_f == 0)."""
    npad = x_col.shape[0]
    fp = omega.shape[1]
    n_tiles = fp // tile_f
    kernel = functools.partial(_snr_tile_kernel, tn=tn)
    out = pl.pallas_call(
        kernel,
        out_shape=jax.ShapeDtypeStruct((n_tiles, 8, 128), jnp.float32),
        grid_spec=pltpu.PrefetchScalarGridSpec(
            num_scalar_prefetch=0,
            grid=(n_tiles,),
            in_specs=[
                # Signal column stays resident across frequency tiles.
                # TODO(synk): for very long signals (N >> 64k) stream x over a
                # second (time) grid axis instead of keeping it resident.
                pl.BlockSpec((npad, 1), lambda j: (0, 0)),
                pl.BlockSpec((1, tile_f), lambda j: (0, j)),
                pl.BlockSpec((1, tile_f), lambda j: (0, j)),
                pl.BlockSpec((1, tile_f), lambda j: (0, j)),
            ],
            out_specs=pl.BlockSpec((1, 8, 128), lambda j: (j, 0, 0)),
        ),
        compiler_params=pltpu.CompilerParams(
            dimension_semantics=("parallel",),          # tiles split across TCs (v7x)
            vmem_limit_bytes=_vmem_limit_bytes(),
        ),
    )(x_col, omega, wmask, umask)
    wanted = jnp.sum(out[:, 0, 0])
    unwanted = jnp.sum(out[:, 1, 0])
    return wanted, unwanted


# ---------------------------------------------------------------------------
# Host-side glue: frequency grids mirror torch.arange (value-dependent lengths
# => built on host with numpy), masks pre-scaled by 1/count, lane-padded.
# ---------------------------------------------------------------------------
def _arange_like_torch(start, end, step):
    num = int(np.ceil((float(end) - float(start)) / float(step)))
    num = max(num, 0)
    return np.float64(start) + np.arange(num, dtype=np.float64) * np.float64(step)


def _build_freq_arrays(f_true, fs, delta, sampling_f, f_range, max_tile_f=512):
    f_min, f_max = float(f_range[0]), float(f_range[1])
    ft = float(f_true)
    f_w = _arange_like_torch(ft - delta, ft + delta + sampling_f, sampling_f)
    f_u1 = _arange_like_torch(f_min, max(ft - delta - sampling_f, f_min), sampling_f)
    f_u2 = _arange_like_torch(ft + delta + sampling_f, f_max + sampling_f, sampling_f)
    f_u = np.concatenate([f_u1, f_u2])
    nw, nu = len(f_w), len(f_u)
    ntot = nw + nu

    # Lane-pad; tile_f multiple of 128, capped at 512 (vreg pressure of the VPU
    # recurrence carries: 4x [8, tile_f] live).
    fp = max(128, int(np.ceil(ntot / 128.0)) * 128)
    tile_f = min(fp, max_tile_f)
    fp = int(np.ceil(fp / float(tile_f))) * tile_f

    omega = np.zeros((1, fp), np.float32)
    wmask = np.zeros((1, fp), np.float32)
    umask = np.zeros((1, fp), np.float32)
    freqs = np.concatenate([f_w, f_u])
    omega[0, :ntot] = (freqs / float(fs)).astype(np.float32)
    if nw > 0:
        wmask[0, :nw] = np.float32(1.0 / nw)
    if nu > 0:
        umask[0, nw:ntot] = np.float32(1.0 / nu)
    # NOTE: if the unwanted set were empty the reference torch code would fail
    # on an empty stack; we keep faithful semantics and do not guard term2=0.
    return omega, wmask, umask, tile_f


def extractor_loss(x, f_true, fs, delta, sampling_f, f_range, tn=256):
    """Faithful port of ExtractorLoss.forward.

    The reference *assigns* (not accumulates) loss_sum inside its loop, so only
    the last sample's SNR survives before dividing by len(x).  We therefore run
    the kernel on x[-1] only (identical result, B x less work).
    """
    x = jnp.asarray(x, jnp.float32)
    b, n = x.shape
    assert b >= 1

    # arange lengths depend on concrete values -> one tiny device->host pull.
    f_true_h = float(np.asarray(jax.device_get(f_true), dtype=np.float64).reshape(-1)[b - 1])
    fs_h = float(np.asarray(jax.device_get(fs), dtype=np.float64).reshape(-1)[b - 1])
    omega, wmask, umask, tile_f = _build_freq_arrays(
        f_true_h, fs_h, float(delta), float(sampling_f), f_range)

    npad = int(np.ceil(n / float(tn))) * tn            # zero-pad contributes nothing
    x_col = jnp.pad(x[b - 1], (0, npad - n)).reshape(npad, 1)

    wanted, unwanted = _pallas_partial_sums(
        x_col, jnp.asarray(omega), jnp.asarray(wmask), jnp.asarray(umask),
        tile_f, tn)

    term1 = wanted * 1000.0
    term2 = unwanted
    snr = 10.0 * jnp.log10(term2 / term1)
    return snr / b


# ---------------------------------------------------------------------------
# float64 numpy reference of the original torch module (self-check only).
# ---------------------------------------------------------------------------
def _extractor_loss_reference_np(x_np, f_true_np, fs_np, delta, sampling_f, f_range):
    f_min, f_max = f_range
    bsz = x_np.shape[0]
    loss_sum = 0.0
    for i in range(bsz):
        xi = x_np[i].astype(np.float64)
        ft, fsv = float(f_true_np[i]), float(fs_np[i])
        nidx = np.arange(xi.shape[0], dtype=np.float64)

        def psd(f):
            ang = 2.0 * np.pi * f * nidx / fsv
            c = np.sum(xi * np.cos(ang))
            s = np.sum(xi * np.sin(ang))
            return c * c + s * s

        f_w = _arange_like_torch(ft - delta, ft + delta + sampling_f, sampling_f)
        f_u1 = _arange_like_torch(f_min, max(ft - delta - sampling_f, f_min), sampling_f)
        f_u2 = _arange_like_torch(ft + delta + sampling_f, f_max + sampling_f, sampling_f)
        f_u = np.concatenate([f_u1, f_u2])
        t1 = np.mean([psd(f) for f in f_w]) * 1000.0
        t2 = np.mean([psd(f) for f in f_u])
        loss_sum = 10.0 * np.log10(t2 / t1)   # assign, mirroring the reference bug
    return loss_sum / bsz


if __name__ == "__main__":
    key = jax.random.PRNGKey(0)
    B, N = 2, 256
    x = jax.random.normal(key, (B, N), dtype=jnp.float32)
    f_true = jnp.array([10.0, 12.5], dtype=jnp.float32)
    fs = jnp.array([100.0, 100.0], dtype=jnp.float32)
    delta, sampling_f, f_range = 2.0, 0.5, (1.0, 40.0)

    loss = extractor_loss(x, f_true, fs, delta, sampling_f, f_range)
    loss = jax.block_until_ready(loss)
    assert bool(jnp.isfinite(loss)), "loss is not finite"

    ref = _extractor_loss_reference_np(np.asarray(x), np.asarray(f_true),
                                       np.asarray(fs), delta, sampling_f, f_range)
    assert abs(float(loss) - float(ref)) < 0.25, (float(loss), float(ref))
    print("KERNEL_OK")
</pallas_src>

<mosaic_0001>
module attributes {stable_mosaic.version = 11 : i64} {
  func.func @_snr_tile_kernel(%arg0: i32, %arg1: memref<256x1xf32, #tpu.memory_space<vmem>>, %arg2: memref<1x128xf32, #tpu.memory_space<vmem>>, %arg3: memref<1x128xf32, #tpu.memory_space<vmem>>, %arg4: memref<1x128xf32, #tpu.memory_space<vmem>>, %arg5: memref<1x8x128xf32, #tpu.memory_space<vmem>>) attributes {dimension_semantics = [#tpu.dimension_semantics<parallel>], iteration_bounds = array<i64: 1>, scalar_prefetch = 0 : i64, scratch_operands = 0 : i64, tpu.core_type = #tpu.core_type<tc>, window_params = [{pipeline_mode = #tpu.pipeline_mode<synchronous>, transform_indices = @transform_0, window_bounds = array<i64: 256, 1>}, {transform_indices = @transform_1, window_bounds = array<i64: 1, 128>}, {transform_indices = @transform_2, window_bounds = array<i64: 1, 128>}, {transform_indices = @transform_3, window_bounds = array<i64: 1, 128>}, {transform_indices = @transform_4, window_bounds = array<i64: 1, 8, 128>}]} {
    %c0 = arith.constant 0 : index
    %c0_0 = arith.constant 0 : index
    %0 = vector.load %arg2[%c0, %c0_0] : memref<1x128xf32, #tpu.memory_space<vmem>>, vector<1x128xf32>
    %cst = arith.constant 8.000000e+00 : f32
    %1 = vector.broadcast %cst : f32 to vector<1x128xf32>
    %2 = arith.mulf %1, %0 : vector<1x128xf32>
    %3 = math.floor %2 : vector<1x128xf32>
    %4 = arith.subf %2, %3 : vector<1x128xf32>
    %cst_1 = arith.constant 6.28318548 : f32
    %5 = vector.broadcast %cst_1 : f32 to vector<1x128xf32>
    %6 = arith.mulf %5, %4 : vector<1x128xf32>
    %7 = math.cos %6 : vector<1x128xf32>
    %cst_2 = arith.constant 6.28318548 : f32
    %8 = vector.broadcast %cst_2 : f32 to vector<1x128xf32>
    %9 = arith.mulf %8, %4 : vector<1x128xf32>
    %10 = math.sin %9 : vector<1x128xf32>
    %11 = tpu.iota {dimensions = array<i32: 0>} : vector<8x128xi32>
    %12 = arith.sitofp %11 : vector<8x128xi32> to vector<8x128xf32>
    %13 = vector.broadcast %0 : vector<1x128xf32> to vector<8x128xf32>
    %14 = arith.mulf %12, %13 : vector<8x128xf32>
    %cst_3 = arith.constant 2.560000e+02 : f32
    %15 = vector.broadcast %cst_3 : f32 to vector<1x128xf32>
    %16 = arith.mulf %15, %0 : vector<1x128xf32>
    %17 = math.floor %16 : vector<1x128xf32>
    %18 = arith.subf %16, %17 : vector<1x128xf32>
    %cst_4 = arith.constant 0.000000e+00 : f32
    %19 = vector.broadcast %cst_4 : f32 to vector<1x128xf32>
    %cst_5 = arith.constant 0.000000e+00 : f32
    %20 = vector.broadcast %cst_5 : f32 to vector<8x128xf32>
    %cst_6 = arith.constant 0.000000e+00 : f32
    %21 = vector.broadcast %cst_6 : f32 to vector<8x128xf32>
    %c0_i32 = arith.constant 0 : i32
    %22 = vector.broadcast %19 : vector<1x128xf32> to vector<8x128xf32>
    %23 = arith.addf %22, %14 : vector<8x128xf32>
    %24 = math.floor %23 : vector<8x128xf32>
    %25 = arith.subf %23, %24 : vector<8x128xf32>
    %cst_7 = arith.constant 6.28318548 : f32
    %26 = vector.broadcast %cst_7 : f32 to vector<8x128xf32>
    %27 = arith.mulf %26, %25 : vector<8x128xf32>
    %28 = math.cos %27 : vector<8x128xf32>
    %29 = math.sin %27 : vector<8x128xf32>
    %c0_i32_8 = arith.constant 0 : i32
    %c32_i32 = arith.constant 32 : i32
    %30 = arith.addi %c0_i32_8, %c32_i32 : i32
    %c1_i32 = arith.constant 1 : i32
    %31:4 = scf.for %arg6 = %c0_i32_8 to %30 step %c1_i32 iter_args(%arg7 = %28, %arg8 = %29, %arg9 = %20, %arg10 = %21) -> (vector<8x128xf32>, vector<8x128xf32>, vector<8x128xf32>, vector<8x128xf32>)  : i32 {
      %c256_i32 = arith.constant 256 : i32
      %65 = arith.muli %c0_i32, %c256_i32 : i32
      %c8_i32 = arith.constant 8 : i32
      %66 = arith.muli %arg6, %c8_i32 : i32
      %67 = arith.addi %65, %66 : i32
      %68 = tpu.assume_multiple %67, 8 : i32
      %69 = arith.index_cast %68 : i32 to index
      %c0_25 = arith.constant 0 : index
      %70 = vector.load %arg1[%69, %c0_25] : memref<256x1xf32, #tpu.memory_space<vmem>>, vector<8x1xf32>
      %71 = vector.broadcast %70 : vector<8x1xf32> to vector<8x128xf32>
      %72 = arith.mulf %71, %arg7 : vector<8x128xf32>
      %73 = arith.addf %arg9, %72 : vector<8x128xf32>
      %74 = vector.broadcast %70 : vector<8x1xf32> to vector<8x128xf32>
      %75 = arith.mulf %74, %arg8 : vector<8x128xf32>
      %76 = arith.addf %arg10, %75 : vector<8x128xf32>
      %77 = vector.broadcast %7 : vector<1x128xf32> to vector<8x128xf32>
      %78 = arith.mulf %arg7, %77 : vector<8x128xf32>
      %79 = vector.broadcast %10 : vector<1x128xf32> to vector<8x128xf32>
      %80 = arith.mulf %arg8, %79 : vector<8x128xf32>
      %81 = arith.subf %78, %80 : vector<8x128xf32>
      %82 = vector.broadcast %7 : vector<1x128xf32> to vector<8x128xf32>
      %83 = arith.mulf %arg8, %82 : vector<8x128xf32>
      %84 = vector.broadcast %10 : vector<1x128xf32> to vector<8x128xf32>
      %85 = arith.mulf %arg7, %84 : vector<8x128xf32>
      %86 = arith.addf %83, %85 : vector<8x128xf32>
      scf.yield %81, %86, %73, %76 : vector<8x128xf32>, vector<8x128xf32>, vector<8x128xf32>, vector<8x128xf32>
    }
    %c32_i32_9 = arith.constant 32 : i32
    %32 = arith.addf %19, %18 : vector<1x128xf32>
    %33 = math.floor %32 : vector<1x128xf32>
    %34 = arith.subf %32, %33 : vector<1x128xf32>
    %c1_i32_10 = arith.constant 1 : i32
    %cst_11 = arith.constant dense<0.000000e+00> : vector<128xf32>
    %35 = vector.multi_reduction <add>, %31#2, %cst_11 [0] : vector<8x128xf32> to vector<128xf32>
    %36 = vector.shape_cast %35 : vector<128xf32> to vector<1x128xf32>
    %cst_12 = arith.constant dense<0.000000e+00> : vector<128xf32>
    %37 = vector.multi_reduction <add>, %31#3, %cst_12 [0] : vector<8x128xf32> to vector<128xf32>
    %38 = vector.shape_cast %37 : vector<128xf32> to vector<1x128xf32>
    %39 = arith.mulf %36, %36 : vector<1x128xf32>
    %40 = arith.mulf %38, %38 : vector<1x128xf32>
    %41 = arith.addf %39, %40 : vector<1x128xf32>
    %c0_13 = arith.constant 0 : index
    %c0_14 = arith.constant 0 : index
    %42 = vector.load %arg3[%c0_13, %c0_14] : memref<1x128xf32, #tpu.memory_space<vmem>>, vector<1x128xf32>
    %43 = arith.mulf %41, %42 : vector<1x128xf32>
    %44 = vector.shape_cast %43 : vector<1x128xf32> to vector<1x1x128xf32>
    %cst_15 = arith.constant dense<0.000000e+00> : vector<1xf32>
    %45 = vector.multi_reduction <add>, %44, %cst_15 [1, 2] : vector<1x1x128xf32> to vector<1xf32>
    %46 = vector.shape_cast %45 : vector<1xf32> to vector<1x1x1xf32>
    %47 = vector.extract %46[0, 0, 0] : f32 from vector<1x1x1xf32>
    %c0_16 = arith.constant 0 : index
    %c0_17 = arith.constant 0 : index
    %48 = vector.load %arg4[%c0_16, %c0_17] : memref<1x128xf32, #tpu.memory_space<vmem>>, vector<1x128xf32>
    %49 = arith.mulf %41, %48 : vector<1x128xf32>
    %50 = vector.shape_cast %49 : vector<1x128xf32> to vector<1x1x128xf32>
    %cst_18 = arith.constant dense<0.000000e+00> : vector<1xf32>
    %51 = vector.multi_reduction <add>, %50, %cst_18 [1, 2] : vector<1x1x128xf32> to vector<1xf32>
    %52 = vector.shape_cast %51 : vector<1xf32> to vector<1x1x1xf32>
    %53 = vector.extract %52[0, 0, 0] : f32 from vector<1x1x1xf32>
    %54 = tpu.iota {dimensions = array<i32: 1>} : vector<1x8x128xi32>
    %c0_i32_19 = arith.constant 0 : i32
    %55 = vector.broadcast %c0_i32_19 : i32 to vector<1x8x128xi32>
    %56 = arith.cmpi eq, %54, %55 : vector<1x8x128xi32>
    %c1_i32_20 = arith.constant 1 : i32
    %57 = vector.broadcast %c1_i32_20 : i32 to vector<1x8x128xi32>
    %58 = arith.cmpi eq, %54, %57 : vector<1x8x128xi32>
    %cst_21 = arith.constant 0.000000e+00 : f32
    %59 = vector.broadcast %53 : f32 to vector<1x8x128xf32>
    %60 = vector.broadcast %cst_21 : f32 to vector<1x8x128xf32>
    %61 = arith.select %58, %59, %60 : vector<1x8x128xi1>, vector<1x8x128xf32>
    %62 = vector.broadcast %47 : f32 to vector<1x8x128xf32>
    %63 = arith.select %56, %62, %61 : vector<1x8x128xi1>, vector<1x8x128xf32>
    %c0_22 = arith.constant 0 : index
    %c0_23 = arith.constant 0 : index
    %c0_24 = arith.constant 0 : index
    %64 = vector.load %arg5[%c0_22, %c0_23, %c0_24] : memref<1x8x128xf32, #tpu.memory_space<vmem>>, vector<1x8x128xf32>
    tpu.vector_store %arg5[%c0_22, %c0_23, %c0_24], %63 {strides = array<i32>} : memref<1x8x128xf32, #tpu.memory_space<vmem>>, vector<1x8x128xf32>,
    return
  }
  func.func @transform_0(%arg0: i32) -> (i32, i32) {
    %c0_i32 = arith.constant 0 : i32
    %c0_i32_0 = arith.constant 0 : i32
    %c0_i32_1 = arith.constant 0 : i32
    return %c0_i32, %c0_i32_0 : i32, i32
  }
  func.func @transform_1(%arg0: i32) -> (i32, i32) {
    %c0_i32 = arith.constant 0 : i32
    %c0_i32_0 = arith.constant 0 : i32
    return %c0_i32, %arg0 : i32, i32
  }
  func.func @transform_2(%arg0: i32) -> (i32, i32) {
    %c0_i32 = arith.constant 0 : i32
    %c0_i32_0 = arith.constant 0 : i32
    return %c0_i32, %arg0 : i32, i32
  }
  func.func @transform_3(%arg0: i32) -> (i32, i32) {
    %c0_i32 = arith.constant 0 : i32
    %c0_i32_0 = arith.constant 0 : i32
    return %c0_i32, %arg0 : i32, i32
  }
  func.func @transform_4(%arg0: i32) -> (i32, i32, i32) {
    %c0_i32 = arith.constant 0 : i32
    %c0_i32_0 = arith.constant 0 : i32
    %c0_i32_1 = arith.constant 0 : i32
    return %arg0, %c0_i32, %c0_i32_0 : i32, i32, i32
  }
}

</mosaic_0001>

<bundles_post_ra>
// kernel: tpu_custom_call.1
= control target key start
LH: loop header
LB: loop body
LE: loop exit
PB: predicated region body
PF: predicated region fallthrough
CT: control target
= control target key end

     0   :  { %9 = vsyncpa [#allocation3], 0  ;;  %v332_v1 = vlaneseq  ;;  %v902_v30 = vmov 683565275   ;;  %v903_v32 = vmov 2475754826   ;;  %s1106_s0 = inlined_call_operand.vmem [shape: f32[256,1], index: 0, kind: input, shape index: {}]   ;;  %s1107_s1 = inlined_call_operand.vmem [shape: f32[1,128], index: 1, kind: input, shape index: {}]   ;;  %s1108_s2 = inlined_call_operand.vmem [shape: f32[1,128], index: 2, kind: input, shape index: {}]   ;;  %s1109_s3 = inlined_call_operand.vmem [shape: f32[1,128], index: 3, kind: input, shape index: {}]   ;;  %s1110_s4 = inlined_call_operand.hbm [shape: f32[1,8,128], index: 4, kind: output, shape index: {}]  }
   0x1   :  { %v18_v0 = vld [vmem:[%s1107_s1] sm:$0x1]  ;;  %v904_v34 = vmov 2131351028   ;;  %v905_v36 = vmov 2102212464  }
   0x2   :  { %v19_v2 = vmul.f32 8.0, %v18_v0  ;;  %v939_v4 = vshrl.u32 %v332_v1, 7  ;;  %v834_v5 = vld [vmem:[%s1107_s1] ss:$0 sm:$0xff]  ;;  %v906_v38 = vmov 920167782  }
   0x3   :  { %v907_v47 = vmov 1326507024   ;;  %s1085_s1 = smov 0  }
   0x4   :  { %v20_v3 = vfloor.f32 %v19_v2  ;;  %v334_v7 = vcvt.s32.f32 %v939_v4 }
   0x6   :  { %v21_v6 = vsub.f32 %v19_v2, %v20_v3  ;;  %v338_v9 = vmul.f32 %v834_v5, %v334_v7 }
   0x8   :  { %v945_v8 = vmul.f32 6.2831855, %v21_v6  ;;  %v340_v12 = vfloor.f32 %v338_v9 }
   0xa   :  { %v23_v10 = vand.u32 2147483647, %v945_v8  ;;  %v26_v11 = vand.u32 2139095040, %v945_v8  ;;  %v341_v15 = vsub.f32 %v338_v9, %v340_v12 }
   0xc   :  { %v27_v13 = vshrl.u32 %v26_v11, 23  ;;  %v30_v14 = vand.u32 8388607, %v23_v10  ;;  %v951_v18 = vmul.f32 6.2831855, %v341_v15 }
   0xe   :  { %v768_v16 = vadd.s32 4294967169, %v27_v13  ;;  %v31_v17 = vor.u32 8388608, %v30_v14  ;;  %v346_v20 = vand.u32 2139095040, %v951_v18  ;;  %v343_v24 = vand.u32 2147483647, %v951_v18 }
  0x10   :  { %v33_v19 = vadd.s32 1, %v768_v16  ;;  %v954_v21 = vshll.u32 %v31_v17, 8  ;;  %v347_v22 = vshrl.u32 %v346_v20, 23  ;;  %v350_v41 = vand.u32 8388607, %v343_v24 }
  0x12   :  { %vm34_vm0 = vcmp.gt.s32.totalorder %v33_v19, 0  ;;  %v72_v27 = vand.u32 65535, %v954_v21  ;;  %v774_v28 = vadd.s32 4294967169, %v347_v22  ;;  %v73_v40 = vshrl.u32 %v954_v21, 16 }
  0x13   :  { %v35_v23 = vsel %vm34_vm0, %v33_v19, 0  ;;  %v351_v55 = vor.u32 8388608, %v350_v41 }
  0x14   :  { %v36_v25 = vshrl.u32 %v35_v23, 5  ;;  %v37_v26 = vand.u32 31, %v35_v23  ;;  %v353_v52 = vadd.s32 1, %v774_v28 }
  0x15   :  { %v982_v13 = vshll.u32 %v351_v55, 8 }
  0x16   :  { %v38_v29 = vsub.s32 32, %v37_v26  ;;  %v40_v31 = vshll.u32 %v902_v30, %v37_v26  ;;  %v43_v33 = vshll.u32 %v903_v32, %v37_v26  ;;  %v46_v35 = vshll.u32 %v904_v34, %v37_v26 }
  0x17   :  { %v49_v37 = vshll.u32 %v905_v36, %v37_v26  ;;  %v52_v39 = vshll.u32 %v906_v38, %v37_v26  ;;  %vm55_vm1 = vcmp.lt.s32.totalorder %v36_v25, 1  ;;  %vm58_vm2 = vcmp.lt.s32.totalorder %v36_v25, 4 }
  0x18   :  { %v41_v42 = vshrl.u32 %v903_v32, %v38_v29  ;;  %v44_v43 = vshrl.u32 %v904_v34, %v38_v29  ;;  %v47_v44 = vshrl.u32 %v905_v36, %v38_v29  ;;  %v39_v45 = vshrl.u32 %v902_v30, %v38_v29 }
  0x19   :  { %v50_v46 = vshrl.u32 %v906_v38, %v38_v29  ;;  %v53_v48 = vshrl.u32 %v907_v47, %v38_v29  ;;  %vm57_vm3 = vcmp.lt.s32.totalorder %v36_v25, 3  ;;  %vm56_vm4 = vcmp.lt.s32.totalorder %v36_v25, 2 }
  0x1a   :  { %v42_v49 = vor.u32 %v41_v42, %v40_v31  ;;  %v45_v50 = vor.u32 %v44_v43, %v43_v33  ;;  %v48_v51 = vor.u32 %v47_v44, %v46_v35  ;;  %vm354_vm5 = vcmp.gt.s32.totalorder %v353_v52, 0 }
  0x1b   :  { %v51_v53 = vor.u32 %v50_v46, %v49_v37  ;;  %v54_v54 = vor.u32 %v53_v48, %v52_v39  ;;  %v355_v1 = vsel %vm354_vm5, %v353_v52, 0  ;;  %v908_v43 = vmov 0  }
  0x1c   :  { %v60_v56 = vsel %vm58_vm2, %v48_v51, 2102212464  ;;  %v63_v57 = vsel %vm55_vm1, %v42_v49, %v45_v50  ;;  %v67_v58 = vsel %vm55_vm1, %v45_v50, %v48_v51  ;;  %v59_v59 = vsel %vm55_vm1, %v39_v45, %v42_v49 }
  0x1d   :  { %v64_v60 = vsel %vm58_vm2, %v51_v53, 920167782  ;;  %v68_v61 = vsel %vm58_vm2, %v54_v54, 1326507024  ;;  %v61_v62 = vsel %vm57_vm3, %v45_v50, %v60_v56  ;;  %v977_v5 = vshrl.u32 %v355_v1, 5 }
  0x1e   :  { %v65_v63 = vsel %vm57_vm3, %v48_v51, %v64_v60  ;;  %v69_v0 = vsel %vm57_vm3, %v51_v53, %v68_v61  ;;  %v980_v12 = vsel %vm56_vm4, %v59_v59, %v61_v62  ;;  %v357_v17 = vand.u32 31, %v355_v1 }
  0x1f   :  { %v66_v2 = vsel %vm56_vm4, %v63_v57, %v65_v63  ;;  %v70_v3 = vsel %vm56_vm4, %v67_v58, %v69_v0  ;;  %vm375_vm6 = vcmp.lt.s32.totalorder %v977_v5, 1  ;;  %vm377_vm11 = vcmp.lt.s32.totalorder %v977_v5, 3 }
  0x20   :  { %v74_v6 = vand.u32 65535, %v70_v3  ;;  %v75_v7 = vshrl.u32 %v70_v3, 16  ;;  %v96_v9 = vand.u32 65535, %v66_v2  ;;  %v97_v11 = vshrl.u32 %v66_v2, 16 }
  0x21   :  { %v985_v42 = vsub.s32 32, %v357_v17  ;;  %v360_v45 = vshll.u32 %v902_v30, %v357_v17  ;;  %v363_v48 = vshll.u32 %v903_v32, %v357_v17  ;;  %v366_v57 = vshll.u32 %v904_v34, %v357_v17 }
  0x22   :  { %v76_v14 = vmul.u32 %v74_v6, %v72_v27  ;;  %v77_v15 = vmul.u32 %v75_v7, %v72_v27  ;;  %v78_v16 = vmul.u32 %v74_v6, %v73_v40  ;;  %v79_v19 = vmul.u32 %v75_v7, %v73_v40 }
  0x23   :  { %v98_v20 = vmul.u32 %v96_v9, %v72_v27  ;;  %v99_v22 = vmul.u32 %v97_v11, %v72_v27  ;;  %v100_v23 = vmul.u32 %v96_v9, %v73_v40  ;;  %v101_v31 = vmul.u32 %v97_v11, %v73_v40 }
  0x24   :  { %v80_v26 = vshll.u32 %v77_v15, 16  ;;  %v81_v28 = vshrl.u32 %v77_v15, 16  ;;  %v82_v29 = vshll.u32 %v78_v16, 16  ;;  %v83_v33 = vshrl.u32 %v78_v16, 16 }
  0x25   :  { %v102_v25 = vshll.u32 %v99_v22, 16  ;;  %v103_v35 = vshrl.u32 %v99_v22, 16  ;;  %v104_v37 = vshll.u32 %v100_v23, 16  ;;  %v105_v41 = vshrl.u32 %v100_v23, 16 }
  0x26   :  { %vm84_vm7 = vc.u32 %v76_v14, %v80_v26  ;;  %v86_v39 = vadd.s32 %v80_v26, %v76_v14  ;;  %v361_v54 = vshrl.u32 %v903_v32, %v985_v42  ;;  %v364_v55 = vshrl.u32 %v904_v34, %v985_v42 }
  0x27   :  { %v85_v44 = vsel %vm84_vm7, 1, %v908_v43  ;;  %vm106_vm8 = vc.u32 %v98_v20, %v102_v25  ;;  %v108_v27 = vadd.s32 %v102_v25, %v98_v20  ;;  %v367_v58 = vshrl.u32 %v905_v36, %v985_v42 }
  0x28   :  { %v87_v46 = vadd.s32 %v85_v44, %v79_v19  ;;  %vm88_vm9 = vc.u32 %v86_v39, %v82_v29  ;;  %v107_v40 = vsel %vm106_vm8, 1, %v908_v43  ;;  %v369_v59 = vshll.u32 %v905_v36, %v357_v17 }
  0x29   :  { %v89_v49 = vsel %vm88_vm9, 1, %v908_v43  ;;  %v109_v50 = vadd.s32 %v107_v40, %v101_v31  ;;  %vm110_vm10 = vc.u32 %v108_v27, %v104_v37  ;;  %v992_v51 = vadd.s32 %v108_v27, %v104_v37 }
  0x2a   :  { %v91_v52 = vadd.s32 %v89_v49, %v87_v46  ;;  %v111_v53 = vsel %vm110_vm10, 1, %v908_v43  ;;  %v1003_v61 = vor.u32 %v361_v54, %v360_v45  ;;  %v1005_v62 = vor.u32 %v364_v55, %v363_v48 }
  0x2b   :  { %v113_v56 = vadd.s32 %v111_v53, %v109_v50  ;;  %v370_v63 = vshrl.u32 %v906_v38, %v985_v42  ;;  %v368_v0 = vor.u32 %v367_v58, %v366_v57  ;;  %v372_v1 = vshll.u32 %v906_v38, %v357_v17 }
  0x2c   :  { %v92_v60 = vadd.s32 %v91_v52, %v81_v28  ;;  %v373_v34 = vshrl.u32 %v907_v47, %v985_v42  ;;  %vm378_vm12 = vcmp.lt.s32.totalorder %v977_v5, 4  ;;  %vm376_vm13 = vcmp.lt.s32.totalorder %v977_v5, 2 }
  0x2d   :  { %v114_v32 = vadd.s32 %v113_v56, %v103_v35  ;;  %v371_v3 = vor.u32 %v370_v63, %v369_v59  ;;  %v383_v7 = vsel %vm375_vm6, %v1003_v61, %v1005_v62  ;;  %v116_v38 = vmul.u32 %v954_v21, %v980_v12 }
  0x2e   :  { %v1012_v2 = vadd.s32 %v92_v60, %v83_v33  ;;  %v374_v6 = vor.u32 %v373_v34, %v372_v1  ;;  %v387_v14 = vsel %vm375_vm6, %v1005_v62, %v368_v0  ;;  %v392_v12 = vand.u32 65535, %v982_v13 }
  0x2f   :  { %v115_v36 = vadd.s32 %v114_v32, %v105_v41  ;;  %v384_v47 = vsel %vm378_vm12, %v371_v3, 920167782  ;;  %v393_v16 = vshrl.u32 %v982_v13, 16  ;;  %v359_v54 = vshrl.u32 %v902_v30, %v985_v42 }
  0x30   :  { %vm118_vm14 = vc.u32 %v1012_v2, %v992_v51  ;;  %v385_v11 = vsel %vm377_vm11, %v368_v0, %v384_v47  ;;  %v388_v21 = vsel %vm378_vm12, %v374_v6, 1326507024  ;;  %v380_v1 = vsel %vm378_vm12, %v368_v0, 2102212464 }
  0x31   :  { %v119_v9 = vadd.s32 1, %v115_v36  ;;  %v386_v15 = vsel %vm376_vm13, %v383_v7, %v385_v11  ;;  %v389_v19 = vsel %vm377_vm11, %v371_v3, %v388_v21  ;;  %v381_v11 = vsel %vm377_vm11, %v1005_v62, %v380_v1 }
  0x32   :  { %v416_v20 = vand.u32 65535, %v386_v15  ;;  %v417_v22 = vshrl.u32 %v386_v15, 16  ;;  %v390_v26 = vsel %vm376_vm13, %v387_v14, %v389_v19  ;;  %vm24_vm7 = vcmp.le.f32.partialorder %v23_v10, 0.7853982 }
  0x33   :  { %v120_v17 = vsel %vm118_vm14, %v119_v9, %v115_v36  ;;  %v394_v28 = vand.u32 65535, %v390_v26  ;;  %v395_v29 = vshrl.u32 %v390_v26, 16  ;;  %v379_v9 = vsel %vm375_vm6, %v359_v54, %v1003_v61 }
  0x34   :  { %v121_v23 = vadd.s32 %v120_v17, %v116_v38  ;;  %v419_v31 = vmul.u32 %v417_v22, %v392_v12  ;;  %v418_v25 = vmul.u32 %v416_v20, %v392_v12  ;;  %v420_v41 = vmul.u32 %v416_v20, %v393_v16 }
  0x35   :  { %v396_v35 = vmul.u32 %v394_v28, %v392_v12  ;;  %v397_v37 = vmul.u32 %v395_v29, %v392_v12  ;;  %v398_v39 = vmul.u32 %v394_v28, %v393_v16  ;;  %v399_v45 = vmul.u32 %v395_v29, %v393_v16 }
  0x36   :  { %v122_v33 = vadd.s32 536870912, %v121_v23  ;;  %v422_v27 = vshll.u32 %v419_v31, 16  ;;  %v421_v49 = vmul.u32 %v417_v22, %v393_v16  ;;  %v424_v52 = vshll.u32 %v420_v41, 16 }
  0x37   :  { %v400_v46 = vshll.u32 %v397_v37, 16  ;;  %v402_v40 = vshll.u32 %v398_v39, 16  ;;  %v401_v57 = vshrl.u32 %v397_v37, 16  ;;  %v423_v3 = vshrl.u32 %v419_v31, 16 }
  0x38   :  { %v1042_v44 = vshrl.u32 %v122_v33, 30  ;;  %vm426_vm0 = vc.u32 %v418_v25, %v422_v27  ;;  %v428_v59 = vadd.s32 %v422_v27, %v418_v25  ;;  %v403_v42 = vshrl.u32 %v398_v39, 16 }
  0x39   :  { %vm404_vm15 = vc.u32 %v396_v35, %v400_v46  ;;  %v406_v50 = vadd.s32 %v400_v46, %v396_v35  ;;  %v427_v56 = vsel %vm426_vm0, 1, %v908_v43  ;;  %v425_v38 = vshrl.u32 %v420_v41, 16 }
  0x3a   :  { %v124_v48 = vshll.u32 %v1042_v44, 30  ;;  %v405_v55 = vsel %vm404_vm15, 1, %v908_v43  ;;  %v429_v32 = vadd.s32 %v427_v56, %v421_v49  ;;  %vm430_vm3 = vc.u32 %v428_v59, %v424_v52 }
  0x3b   :  { %v407_v58 = vadd.s32 %v405_v55, %v399_v45  ;;  %vm408_vm1 = vc.u32 %v406_v50, %v402_v40  ;;  %v431_v36 = vsel %vm430_vm3, 1, %v908_v43  ;;  %v432_v21 = vadd.s32 %v428_v59, %v424_v52 }
  0x3c   :  { %v125_v53 = vsub.s32 %v121_v23, %v124_v48  ;;  %v409_v63 = vsel %vm408_vm1, 1, %v908_v43  ;;  %v433_v47 = vadd.s32 %v431_v36, %v429_v32  ;;  %v117_v12 = vadd.s32 %v992_v51, %v1012_v2 }
  0x3d   :  { %v411_v34 = vadd.s32 %v409_v63, %v407_v58  ;;  %v382_v43 = vsel %vm376_vm13, %v379_v9, %v381_v11  ;;  %vm25_vm6 = vcmp.lt.s32.totalorder %v945_v8, 0  ;;  %v147_v39 = vsub.s32 4, %v1042_v44 }
  0x3e   :  { %vm126_vm2 = vcmp.lt.s32.totalorder %v125_v53, 0  ;;  %v127_v60 = vsub.s32 0, %v125_v53  ;;  %v434_v14 = vadd.s32 %v433_v47, %v423_v3  ;;  %v436_v22 = vmul.u32 %v982_v13, %v382_v43 }
  0x3f   :  { %v412_v7 = vadd.s32 %v411_v34, %v401_v57  ;;  %v148_v46 = vsel %vm25_vm6, %v147_v39, %v1042_v44  ;;  %vm166_vm0 = vweird.f32 %v945_v8  ;;  %vm345_vm1 = vcmp.lt.s32.totalorder %v951_v18, 0 }
  0x40   :  { %v128_v30 = vsel %vm126_vm2, %v127_v60, %v125_v53  ;;  %v435_v16 = vadd.s32 %v434_v14, %v425_v38  ;;  %v150_v52 = vsel %vm24_vm7, 0, %v148_v46  ;;  %vm344_vm2 = vcmp.le.f32.partialorder %v343_v24, 0.7853982 }
  0x41   :  { %v129_v6 = vclz %v128_v30  ;;  %v413_v15 = vadd.s32 %v412_v7, %v403_v42  ;;  %v321_v59 = vadd.s32 3, %v150_v52  ;;  %v167_v30 = vand.u32 3, %v150_v52 }
  0x42   :  { %v439_v26 = vadd.s32 1, %v435_v16 }
  0x43   :  { %v769_v0 = vadd.s32 4294967294, %v129_v6  ;;  %vm438_vm5 = vc.u32 %v413_v15, %v432_v21  ;;  %v437_v63 = vadd.s32 %v432_v21, %v413_v15  ;;  %v322_v42 = vand.u32 3, %v321_v59 }
  0x44   :  { %v440_v31 = vsel %vm438_vm5, %v439_v26, %v435_v16  ;;  %vm172_vm10 = vcmp.eq.s32.totalorder %v167_v30, 2  ;;  %vm168_vm12 = vcmp.lt.s32.totalorder %v167_v30, 2  ;;  %vm169_vm13 = vcmp.eq.s32.totalorder %v167_v30, 0 }
  0x45   :  { %vm770_vm4 = vcmp.lt.s32.totalorder %v769_v0, 0  ;;  %v441_v33 = vadd.s32 %v440_v31, %v436_v22  ;;  %vm327_vm11 = vcmp.eq.s32.totalorder %v322_v42, 2  ;;  %vm324_vm14 = vcmp.eq.s32.totalorder %v322_v42, 0 }
  0x46   :  { %v132_v17 = vsel %vm770_vm4, 0, %v769_v0  ;;  %vm323_vm15 = vcmp.lt.s32.totalorder %v322_v42, 2 }
  0x47   :  { %v133_v19 = vsub.s32 32, %v132_v17  ;;  %v134_v20 = vshll.u32 %v125_v53, %v132_v17  ;;  %v137_v61 = vsub.s32 4294967266, %v132_v17  ;;  %v442_v25 = vadd.s32 536870912, %v441_v33 }
  0x49   :  { %v135_v62 = vshrl.u32 %v117_v12, %v133_v19  ;;  %v138_v23 = vadd.s32 127, %v137_v61  ;;  %v1064_v35 = vshrl.u32 %v442_v25, 30 }
  0x4b   :  { %v136_v28 = vor.u32 %v135_v62, %v134_v20  ;;  %v139_v29 = vshll.u32 %v138_v23, 23  ;;  %v444_v13 = vshll.u32 %v1064_v35, 30  ;;  %v467_v31 = vsub.s32 4, %v1064_v35 }
  0x4d   :  { %v140_v51 = vor.u32 4788187, %v139_v29  ;;  %v143_v2 = vcvt.s32.f32 %v136_v28  ;;  %v445_v27 = vsub.s32 %v441_v33, %v444_v13 }
  0x4f   :  { %v141_v5 = vand.u32 2147483647, %v140_v51  ;;  %vm446_vm8 = vcmp.lt.s32.totalorder %v445_v27, 0  ;;  %v447_v48 = vsub.s32 0, %v445_v27 }
  0x51   :  { %v144_v37 = vmul.f32 %v143_v2, %v141_v5  ;;  %v448_v50 = vsel %vm446_vm8, %v447_v48, %v445_v27 }
  0x52   :  { %v449_v55 = vclz %v448_v50 }
  0x53   :  { %v145_v41 = vxor.u32 2147483648, %v144_v37 }
  0x54   :  { %v775_v58 = vadd.s32 4294967294, %v449_v55 }
  0x55   :  { %v146_v45 = vsel %vm25_vm6, %v145_v41, %v144_v37 }
  0x56   :  { %v149_v40 = vsel %vm24_vm7, %v945_v8, %v146_v45  ;;  %vm776_vm9 = vcmp.lt.s32.totalorder %v775_v58, 0  ;;  %v468_v8 = vsel %vm345_vm1, %v467_v31, %v1064_v35 }
  0x57   :  { %v151_v49 = vmul.f32 %v149_v40, %v149_v40  ;;  %v452_v32 = vsel %vm776_vm9, 0, %v775_v58  ;;  %v470_v5 = vsel %vm344_vm2, 0, %v468_v8  ;;  %vm486_vm9 = vweird.f32 %v951_v18 }
  0x58   :  { %v453_v34 = vsub.s32 32, %v452_v32  ;;  %v454_v3 = vshll.u32 %v445_v27, %v452_v32  ;;  %v457_v36 = vsub.s32 4294967266, %v452_v32  ;;  %v641_v27 = vadd.s32 3, %v470_v5 }
  0x59   :  { %v152_v53 = vmul.f32 -0.001358992, %v151_v49  ;;  %v159_v54 = vmul.f32 -0.00019511016, %v151_v49 }
  0x5a   :  { %v455_v38 = vshrl.u32 %v437_v63, %v453_v34  ;;  %v458_v47 = vadd.s32 127, %v457_v36  ;;  %v642_v50 = vand.u32 3, %v641_v27  ;;  %v886_v34 = vmov 0.0  }
  0x5b   :  { %v153_v56 = vadd.f32 0.041655596, %v152_v53  ;;  %v160_v57 = vadd.f32 0.008332121, %v159_v54 }
  0x5c   :  { %v456_v0 = vor.u32 %v455_v38, %v454_v3  ;;  %v459_v14 = vshll.u32 %v458_v47, 23  ;;  %vm647_vm4 = vcmp.eq.s32.totalorder %v642_v50, 2  ;;  %vm644_vm7 = vcmp.eq.s32.totalorder %v642_v50, 0 }
  0x5d   :  { %v154_v10 = vmul.f32 %v153_v56, %v151_v49  ;;  %v161_v60 = vmul.f32 %v160_v57, %v151_v49  ;;  %vm643_vm8 = vcmp.lt.s32.totalorder %v642_v50, 2 }
  0x5e   :  { %v460_v12 = vor.u32 4788187, %v459_v14  ;;  %v463_v43 = vcvt.s32.f32 %v456_v0 }
  0x5f   :  { %v155_v44 = vadd.f32 -0.4999988, %v154_v10  ;;  %v162_v1 = vadd.f32 -0.16666654, %v161_v60 }
  0x60   :  { %v461_v20 = vand.u32 2147483647, %v460_v12 }
  0x61   :  { %v156_v6 = vmul.f32 %v155_v44, %v151_v49  ;;  %v163_v7 = vmul.f32 %v162_v1, %v151_v49  ;;  %v487_v49 = vand.u32 3, %v470_v5  ;;  %v882_v1 = vmov 0.0  }
  0x62   :  { %v464_v26 = vmul.f32 %v463_v43, %v461_v20 }
  0x63   :  { %v157_v9 = vadd.f32 1.0, %v156_v6  ;;  %v164_v11 = vadd.f32 1.0, %v163_v7  ;;  %vm492_vm3 = vcmp.eq.s32.totalorder %v487_v49, 2  ;;  %vm488_vm5 = vcmp.lt.s32.totalorder %v487_v49, 2 }
  0x64   :  { %v465_v33 = vxor.u32 2147483648, %v464_v26  ;;  %vm489_vm6 = vcmp.eq.s32.totalorder %v487_v49, 0 }
  0x65   :  { %v165_v15 = vmul.f32 %v164_v11, %v149_v40  ;;  %v173_v21 = vxor.u32 2147483648, %v157_v9 }
  0x66   :  { %v466_v51 = vsel %vm345_vm1, %v465_v33, %v464_v26 }
  0x67   :  { %v170_v16 = vxor.u32 2147483648, %v165_v15  ;;  %v174_v17 = vsel %vm172_vm10, %v173_v21, %v165_v15  ;;  %v329_v19 = vsel %vm327_vm11, %v173_v21, %v165_v15  ;;  %v469_v2 = vsel %vm344_vm2, %v951_v18, %v466_v51 }
  0x68   :  { %v471_v25 = vmul.f32 %v469_v2, %v469_v2 }
  0x69   :  { %v171_v61 = vsel %vm169_vm13, %v157_v9, %v170_v16  ;;  %v326_v22 = vsel %vm324_vm14, %v157_v9, %v170_v16 }
  0x6a   :  { %v175_v62 = vsel %vm168_vm12, %v171_v61, %v174_v17  ;;  %v330_v23 = vsel %vm323_vm15, %v326_v22, %v329_v19  ;;  %v472_v37 = vmul.f32 -0.001358992, %v471_v25  ;;  %v479_v39 = vmul.f32 -0.00019511016, %v471_v25 }
  0x6b   :  { %v1074_v28 = vsel %vm166_vm0, nan, %v175_v62  ;;  %v1076_v29 = vsel %vm166_vm0, nan, %v330_v23 }
  0x6c   :  { %v473_v13 = vadd.f32 0.041655596, %v472_v37  ;;  %v480_v41 = vadd.f32 0.008332121, %v479_v39 }
  0x6e   :  { %v474_v45 = vmul.f32 %v473_v13, %v471_v25  ;;  %v481_v46 = vmul.f32 %v480_v41, %v471_v25 }
  0x70   :  { %v475_v40 = vadd.f32 -0.4999988, %v474_v45  ;;  %v482_v48 = vadd.f32 -0.16666654, %v481_v46 }
  0x72   :  { %v476_v24 = vmul.f32 %v475_v40, %v471_v25  ;;  %v483_v52 = vmul.f32 %v482_v48, %v471_v25 }
  0x74   :  { %v477_v53 = vadd.f32 1.0, %v476_v24  ;;  %v484_v54 = vadd.f32 1.0, %v483_v52 }
  0x76   :  { %v485_v35 = vmul.f32 %v484_v54, %v469_v2  ;;  %v493_v55 = vxor.u32 2147483648, %v477_v53 }
  0x78   :  { %v490_v56 = vxor.u32 2147483648, %v485_v35  ;;  %v494_v57 = vsel %vm492_vm3, %v493_v55, %v485_v35  ;;  %v649_v58 = vsel %vm647_vm4, %v493_v55, %v485_v35 }
  0x7a   :  { %v491_v59 = vsel %vm489_vm6, %v477_v53, %v490_v56  ;;  %v646_v10 = vsel %vm644_vm7, %v477_v53, %v490_v56 }
  0x7b   :  { %v495_v60 = vsel %vm488_vm5, %v491_v59, %v494_v57  ;;  %v650_v63 = vsel %vm643_vm8, %v646_v10, %v649_v58 }
  0x7c   :  { %v496_v32 = vsel %vm486_vm9, nan, %v495_v60   ;;  %v651_v44 = vsel %vm486_vm9, nan, %v650_v63  }
  0x7d   :  { %v890_v3 = vmov %v651_v44   ;;  %v894_v30 = vmov %v496_v32  }
  0x7e LB: > { %v909_v18 = vmov 0   ;;  %s780_s19 = sshll.u32 %s900_s1, 3  ;;  %v675_v36 = vperm.slane %v1074_v28, 0  ;;  %v679_v6 = vperm.slane %v1076_v29, 0  ;;  %s657_s1 = sadd.s32 1, %s900_s1   ;;  %s900_s1 = sphi %s1085_s1, %s657_s1   ;;  %v896_v30 = vphi %v894_v30, %v895_v30   ;;  %v892_v3 = vphi %v890_v3, %v891_v3   ;;  %v888_v34 = vphi %v886_v34, %v887_v34   ;;  %v884_v1 = vphi %v882_v1, %v883_v1  }
  0x7f   : > { %835 = vset.pattern.permute.xlu0 %v909_v18  ;;  %s663_s22 = scalar_lea.vmem %s1106_s0, %s780_s19  ;;  %p654_p0 = scmp.ge.s32.totalorder %s657_s1, 32  }
  0x80   : > { %v664_v42 = vld [vmem:[%s663_s22] sm:$0xff]  ;;  %v677_v7 = vmul.f32 %v896_v30, %v675_v36  ;;  %v681_v38 = vmul.f32 %v892_v3, %v679_v6  ;;  %v683_v47 = vmul.f32 %v892_v3, %v675_v36  ;;  %v684_v9 = vmul.f32 %v896_v30, %v679_v6  ;;  %s740_s29 = sshll.u32 (%p654_p0), %s1110_s4, 4  ;;  %s741_s29 = int_to_ptr.hbm [resolvable:$true] %s740_s29 }
  0x81   : > { %667 = vperm.xlu0 %835, %v664_v42   ;;  %v701_v25 = vld [vmem:[%s1108_s2] sm:$0x1] (%p654_p0)  ;;  %vm703_vm10 = vcmask (%p654_p0), 1040384   ;;  %s910_s2 = smov (%p654_p0), [#allocation2]   ;;  %vm727_vm11 = vcmp.eq.s32.totalorder (%p654_p0), %v939_v4, 1  ;;  %vm726_vm12 = vcmp.eq.s32.totalorder (%p654_p0), %v939_v4, 0 }
  0x82   : > { %v682_v11 = vsub.f32 %v677_v7, %v681_v38   ;;  %v685_v0 = vadd.f32 %v684_v9, %v683_v47   ;;  %v714_v29 = vld [vmem:[%s1109_s3] sm:$0x1] (%p654_p0)  ;;  %s738_s3 = sshll.u32 (%p654_p0), %s910_s2, 4  ;;  %s739_s3 = int_to_ptr.vmem [resolvable:$true] %s738_s3 }
  0xf3   : > { %v668_v14 = vpop.permute.xlu0 %667 }
  0xf4   : > { %v670_v15 = vmul.f32 %v896_v30, %v668_v14  ;;  %v672_v21 = vmul.f32 %v892_v3, %v668_v14  ;;  %v891_v3 = vmov %v685_v0   ;;  %v895_v30 = vmov %v682_v11   ;;  %656 = sbr.rel (!%p654_p0) target bundleno = 126 (0x7e), region = 44 }
  0xf6   : > { %v671_v12 = vadd.f32 %v888_v34, %v670_v15   ;;  %v673_v43 = vadd.f32 %v884_v1, %v672_v21  }
  0xf8   : > { %v883_v1 = vmov %v673_v43   ;;  %v887_v34 = vmov %v671_v12   ;;  %v686_v16 = vrot.slane (%p654_p0), %v671_v12, 4  ;;  %v692_v17 = vrot.slane (%p654_p0), %v673_v43, 4 }
  0xfa   :  { %v687_v19 = vadd.f32 %v686_v16, %v671_v12  ;;  %v693_v20 = vadd.f32 %v692_v17, %v673_v43 }
  0xfc   :  { %v688_v61 = vrot.slane %v687_v19, 2  ;;  %v694_v22 = vrot.slane %v693_v20, 2 }
  0xfe   :  { %v689_v62 = vadd.f32 %v688_v61, %v687_v19  ;;  %v695_v23 = vadd.f32 %v694_v22, %v693_v20 }
 0x100   :  { %v690_v26 = vrot.slane %v689_v62, 1  ;;  %v696_v31 = vrot.slane %v695_v23, 1 }
 0x102   :  { %v691_v33 = vadd.f32 %v690_v26, %v689_v62  ;;  %v697_v51 = vadd.f32 %v696_v31, %v695_v23 }
 0x104   :  { %v698_v8 = vmul.f32 %v691_v33, %v691_v33  ;;  %v699_v2 = vmul.f32 %v697_v51, %v697_v51 }
 0x106   :  { %v700_v5 = vadd.f32 %v699_v2, %v698_v8 }
 0x108   :  { %v702_v28 = vmul.f32 %v701_v25, %v700_v5  ;;  %v715_v39 = vmul.f32 %v714_v29, %v700_v5 }
 0x10a   :  { %v704_v37 = vsel %vm703_vm10, %v702_v28, 0.0  ;;  %v716_v13 = vsel %vm703_vm10, %v715_v39, 0.0 }
 0x10b   :  { %705 = vadd.xlane.f32.xlu0 %v704_v37 }
 0x113   :  { %717 = vadd.xlane.f32.xlu0 %v716_v13 }
 0x17e   :  { %v706_v41 = vpop.xlane.xlu0 %705 }
 0x17f   :  { %v707_v27 = vrot.slane %v706_v41, 4 }
 0x181   :  { %v708_v45 = vadd.f32 %v707_v27, %v706_v41 }
 0x183   :  { %v709_v46 = vrot.slane %v708_v45, 2 }
 0x185   :  { %v710_v40 = vadd.f32 %v709_v46, %v708_v45 }
 0x186   :  { %v718_v48 = vpop.xlane.xlu0 %717 }
 0x187   :  { %v719_v49 = vrot.slane %v718_v48, 4  ;;  %v711_v50 = vrot.slane %v710_v40, 1 }
 0x189   :  { %v720_v24 = vadd.f32 %v719_v49, %v718_v48  ;;  %v712_v52 = vadd.f32 %v711_v50, %v710_v40 }
 0x18b   :  { %v721_v53 = vrot.slane %v720_v24, 2  ;;  %781 = vpush %v712_v52 }
 0x18d   :  { %v722_v54 = vadd.f32 %v721_v53, %v720_v24 }
 0x18f   :  { %v723_v35 = vrot.slane %v722_v54, 1 }
 0x191   :  { %v724_v55 = vadd.f32 %v723_v35, %v722_v54 }
 0x193   :  { %783 = vpush %v724_v55 }
 0x1bc   :  { %s782_s26 = spop %781 }
 0x1bd   :  { %v730_v57 = vstv %s782_s26 }
 0x1c4   :  { %s784_s30 = spop %783 }
 0x1c5   :  { %v728_v56 = vstv %s784_s30 }
 0x1c6   :  { %v729_v58 = vsel %vm727_vm11, %v728_v56, 0.0 }
 0x1c7   :  { %v731_v59 = vsel %vm726_vm12, %v730_v57, %v729_v58 }
 0x1c8   :  { %732 = vst [vmem:[#allocation2] sm:$0xff] %v731_v59 }
 0x1c9   :  { %743 = dma.vmem_to_hbm [thread:$0]  %s739_s3, 128, %s741_s29, [#allocation3]  }
 0x1ca   :  { %880 = dma.done.wait [#allocation3], 128  }
 0x1cb   :  { %881 = vsyncadd [#allocation3], 4294967168 }
 0x1cc   :  { %748 = vsyncpa [#allocation3], 1 }

</bundles_post_ra>
